<compile_context>
chip_gen: v7x
topology: tpu7x:2x2x1
jax: 0.10.0
libtpu: 0.0.40
codegen_flags: <defaults>
</compile_context>

<pallas_src>
import functools

import jax
import jax.numpy as jnp
from jax.experimental import pallas as pl
from jax.experimental.pallas import tpu as pltpu

_INV_SQRT2 = 0.7071067811865476
_SQRT_2_OVER_PI = 0.7978845608028654


def _gelu(h, approximate):
    if approximate:
        # tanh approximation -> EUP slot (opt-in; does not bit-match torch default)
        return 0.5 * h * (1.0 + jnp.tanh(_SQRT_2_OVER_PI * (h + 0.044715 * h * h * h)))
    # exact erf GELU, matching torch.nn.functional.gelu default
    return 0.5 * h * (1.0 + jax.lax.erf(h * _INV_SQRT2))


def _mlp_kernel_full(x_ref, w1_ref, b1_ref, w2_ref, b2_ref, o_ref, *,
                     approximate, matmul_dtype):
    """Whole W1/W2 resident in VMEM; grid = (row tiles,)."""
    x = x_ref[...]
    w1 = w1_ref[...]
    w2 = w2_ref[...]
    if matmul_dtype is not None:
        x = x.astype(matmul_dtype)
        w1 = w1.astype(matmul_dtype)
        w2 = w2.astype(matmul_dtype)
    h = jnp.dot(x, w1, preferred_element_type=jnp.float32)
    h = h + b1_ref[...].astype(jnp.float32)
    h = _gelu(h, approximate)
    out = jnp.dot(h.astype(w2.dtype), w2, preferred_element_type=jnp.float32)
    o_ref[...] = (out + b2_ref[...].astype(jnp.float32)).astype(o_ref.dtype)


def _mlp_kernel_chunked(x_ref, w1_ref, b1_ref, w2_ref, b2_ref, o_ref, *scratch,
                        approximate, matmul_dtype):
    """Hidden dim streamed in chunks along grid axis 1 (innermost, 'arbitrary').

    If `scratch` is empty, f32 accumulation happens directly in o_ref
    (only used when the output dtype is float32)."""
    acc_ref = scratch[0] if scratch else o_ref
    k = pl.program_id(1)

    @pl.when(k == 0)
    def _init():
        acc_ref[...] = jnp.zeros_like(acc_ref)

    x = x_ref[...]
    w1 = w1_ref[...]
    w2 = w2_ref[...]
    if matmul_dtype is not None:
        x = x.astype(matmul_dtype)
        w1 = w1.astype(matmul_dtype)
        w2 = w2.astype(matmul_dtype)

    h = jnp.dot(x, w1, preferred_element_type=jnp.float32)
    h = h + b1_ref[...].astype(jnp.float32)
    h = _gelu(h, approximate)
    acc_ref[...] += jnp.dot(h.astype(w2.dtype), w2,
                            preferred_element_type=jnp.float32)

    @pl.when(k == pl.num_programs(1) - 1)
    def _finalize():
        if scratch:
            o_ref[...] = (acc_ref[...]
                          + b2_ref[...].astype(jnp.float32)).astype(o_ref.dtype)
        else:
            o_ref[...] += b2_ref[...].astype(jnp.float32)


def _round_up(n, m):
    return ((n + m - 1) // m) * m


def _pick_divisor_tile(total, cap, align):
    """Largest multiple of `align` that divides `total` and is <= cap.
    Caller guarantees total % align == 0."""
    t = min((cap // align) * align, total)
    t = max(t, align)
    while t > align and total % t != 0:
        t -= align
    return t


def mlp_forward(x, w1, b1, w2, b2, *, tm=None, th=None,
                approximate_gelu=False, matmul_dtype=None):
    """Fused MLP forward: gelu(x @ w1 + b1) @ w2 + b2.

    x: (N, E); w1: (E, H); b1: (H,); w2: (H, E); b2: (E,).
    Weights are (in_features, out_features) (transposed vs torch Linear.weight).
    """
    N, E = x.shape
    H = w1.shape[1]
    assert w1.shape == (E, H) and w2.shape == (H, E)
    assert b1.shape == (H,) and b2.shape == (E,)

    out_dtype = x.dtype
    isz = lambda a: jnp.dtype(a.dtype).itemsize
    isz_x, isz_w1, isz_b1 = isz(x), isz(w1), isz(b1)
    isz_w2, isz_b2 = isz(w2), isz(b2)
    isz_o = jnp.dtype(out_dtype).itemsize

    # Per-generation VMEM budget with ~25% headroom for Pallas internal
    # scratch / semaphores. Fallback 64 MiB = smallest generation (v7x).
    try:
        vmem_cap = int(pltpu.get_tpu_info().vmem_capacity_bytes)
    except Exception:
        vmem_cap = 64 << 20
    budget = vmem_cap * 3 // 4

    def chunked_bytes(tm_, th_):
        # Double-buffered blocks + f32 accumulator + f32 GELU intermediate slack.
        return (2 * tm_ * E * isz_x            # x row tile
                + 2 * E * th_ * isz_w1         # w1 hidden chunk
                + 2 * 8 * th_ * isz_b1         # b1 chunk (sublane padded)
                + 2 * th_ * E * isz_w2         # w2 hidden chunk
                + 2 * 8 * E * isz_b2           # b2
                + 2 * tm_ * E * isz_o          # out row tile
                + tm_ * E * 4                  # f32 accumulator
                + 2 * tm_ * th_ * 4)           # in-kernel f32 h intermediate

    row_align = 16 if isz_x < 4 else 8
    min_th = min(H, 128)

    # --- row tile: sets arithmetic intensity vs. re-streamed weights ---------
    if tm is None:
        if N <= 512:
            tm = _round_up(max(N, 1), row_align)
        elif N >= 2048 and chunked_bytes(1024, min_th) <= budget:
            tm = 1024
        else:
            tm = 512
        while tm > row_align and chunked_bytes(tm, min_th) > budget:
            tm = max(row_align, (tm // 2) // row_align * row_align)

    # --- hidden tile: whole-weights fast path, else VMEM-aware chunking ------
    use_full = False
    if th is None:
        full_bytes = (2 * E * H * isz_w1 + 2 * H * E * isz_w2
                      + 2 * 8 * H * isz_b1 + 2 * 8 * E * isz_b2
                      + 2 * tm * E * isz_x + 2 * tm * E * isz_o
                      + 2 * tm * H * 4)        # f32 GELU intermediate
        if full_bytes <= budget:
            use_full = True
            th = H
        elif H < 128 or H % 128 != 0:
            th = H
        else:
            per_th = (2 * E * isz_w1 + 2 * 8 * isz_b1 + 2 * E * isz_w2
                      + 2 * tm * 4)
            fixed = (2 * tm * E * isz_x + 2 * tm * E * isz_o
                     + 2 * 8 * E * isz_b2 + tm * E * 4)
            th_budget = max((budget - fixed) // per_th, 128)
            th = _pick_divisor_tile(H, min(int(th_budget), 2048), 128)
    else:
        assert H % th == 0, "explicit th must divide the hidden dim"

    b1_2d = b1.reshape(1, H)
    b2_2d = b2.reshape(1, E)
    n_row_tiles = pl.cdiv(N, tm)   # ragged last block handled by masked writeback

    if use_full:
        grid = (n_row_tiles,)
        in_specs = [
            pl.BlockSpec((tm, E), lambda i: (i, 0)),   # x row tile
            pl.BlockSpec((E, H), lambda i: (0, 0)),    # w1 (resident)
            pl.BlockSpec((1, H), lambda i: (0, 0)),    # b1
            pl.BlockSpec((H, E), lambda i: (0, 0)),    # w2 (resident)
            pl.BlockSpec((1, E), lambda i: (0, 0)),    # b2
        ]
        out_specs = pl.BlockSpec((tm, E), lambda i: (i, 0))
        scratch_shapes = []
        semantics = ("parallel",)
        kernel = functools.partial(_mlp_kernel_full,
                                   approximate=approximate_gelu,
                                   matmul_dtype=matmul_dtype)
        est = full_bytes
    else:
        grid = (n_row_tiles, H // th)
        in_specs = [
            pl.BlockSpec((tm, E), lambda i, k: (i, 0)),   # x row tile
            pl.BlockSpec((E, th), lambda i, k: (0, k)),   # w1 hidden chunk
            pl.BlockSpec((1, th), lambda i, k: (0, k)),   # b1 chunk
            pl.BlockSpec((th, E), lambda i, k: (k, 0)),   # w2 hidden chunk
            pl.BlockSpec((1, E), lambda i, k: (0, 0)),    # b2
        ]
        out_specs = pl.BlockSpec((tm, E), lambda i, k: (i, 0))
        needs_scratch = jnp.dtype(out_dtype) != jnp.float32
        scratch_shapes = ([pltpu.VMEM((tm, E), jnp.float32)]
                          if needs_scratch else [])
        semantics = ("parallel", "arbitrary")
        kernel = functools.partial(_mlp_kernel_chunked,
                                   approximate=approximate_gelu,
                                   matmul_dtype=matmul_dtype)
        est = chunked_bytes(tm, th)

    vmem_limit = int(min(vmem_cap, max(est + (16 << 20), 32 << 20)))

    cost = pl.CostEstimate(
        flops=4 * N * E * H,                 # two matmuls: 2*N*E*H each
        transcendentals=N * H,               # one erf/tanh per hidden element
        bytes_accessed=(x.size * isz_x + w1.size * isz_w1 + b1.size * isz_b1
                        + w2.size * isz_w2 + b2.size * isz_b2 + N * E * isz_o),
    )

    return pl.pallas_call(
        kernel,
        out_shape=jax.ShapeDtypeStruct((N, E), out_dtype),
        grid_spec=pltpu.PrefetchScalarGridSpec(
            num_scalar_prefetch=0,
            grid=grid,
            in_specs=in_specs,
            out_specs=out_specs,
            scratch_shapes=scratch_shapes,
        ),
        compiler_params=pltpu.CompilerParams(
            dimension_semantics=semantics,
            vmem_limit_bytes=vmem_limit,
        ),
        cost_estimate=cost,
    )(x, w1, b1_2d, w2, b2_2d)


def _reference(x2d, w1, b1, w2, b2):
    x2d = x2d.astype(jnp.float32)
    h = jnp.dot(x2d, w1.astype(jnp.float32)) + b1.astype(jnp.float32)
    h = 0.5 * h * (1.0 + jax.lax.erf(h * _INV_SQRT2))
    return jnp.dot(h, w2.astype(jnp.float32)) + b2.astype(jnp.float32)


if __name__ == "__main__":
    key = jax.random.PRNGKey(0)

    # --- Check 1: module-sized shapes (batch=2, seq=8, E=32) -> full-weights path
    batch, seq, E = 2, 8, 32
    H = 4 * E
    k_x, k_w1, k_b1, k_w2, k_b2 = jax.random.split(key, 5)
    x = jax.random.normal(k_x, (batch, seq, E), dtype=jnp.float32)
    w1 = jax.random.normal(k_w1, (E, H), dtype=jnp.float32) * 0.02   # (in, out)
    b1 = jax.random.normal(k_b1, (H,), dtype=jnp.float32) * 0.02
    w2 = jax.random.normal(k_w2, (H, E), dtype=jnp.float32) * 0.02
    b2 = jax.random.normal(k_b2, (E,), dtype=jnp.float32) * 0.02

    x2d = x.reshape(batch * seq, E)
    out = mlp_forward(x2d, w1, b1, w2, b2).reshape(batch, seq, E)
    jax.block_until_ready(out)
    ref = _reference(x2d, w1, b1, w2, b2).reshape(batch, seq, E)
    assert jnp.allclose(out, ref, atol=1e-5, rtol=1e-5), "mismatch (check 1)"

    # --- Check 2: chunked path, ragged last row block, f32 direct-accumulate ---
    E2, H2, N2 = 128, 512, 100
    k_x, k_w1, k_b1, k_w2, k_b2 = jax.random.split(jax.random.PRNGKey(1), 5)
    x2 = jax.random.normal(k_x, (N2, E2), dtype=jnp.float32)
    w1_2 = jax.random.normal(k_w1, (E2, H2), dtype=jnp.float32) * 0.02
    b1_2 = jax.random.normal(k_b1, (H2,), dtype=jnp.float32) * 0.02
    w2_2 = jax.random.normal(k_w2, (H2, E2), dtype=jnp.float32) * 0.02
    b2_2 = jax.random.normal(k_b2, (E2,), dtype=jnp.float32) * 0.02

    out2 = mlp_forward(x2, w1_2, b1_2, w2_2, b2_2, tm=64, th=128)
    jax.block_until_ready(out2)
    ref2 = _reference(x2, w1_2, b1_2, w2_2, b2_2)
    assert jnp.allclose(out2, ref2, atol=1e-4, rtol=1e-4), "mismatch (check 2)"

    # --- Check 3: bf16 chunked path with f32 accumulator scratch ---------------
    E3, H3, N3 = 256, 1024, 256
    k_x, k_w1, k_b1, k_w2, k_b2 = jax.random.split(jax.random.PRNGKey(2), 5)
    x3 = jax.random.normal(k_x, (N3, E3), dtype=jnp.bfloat16)
    w1_3 = (jax.random.normal(k_w1, (E3, H3), dtype=jnp.float32) * 0.02).astype(jnp.bfloat16)
    b1_3 = (jax.random.normal(k_b1, (H3,), dtype=jnp.float32) * 0.02).astype(jnp.bfloat16)
    w2_3 = (jax.random.normal(k_w2, (H3, E3), dtype=jnp.float32) * 0.02).astype(jnp.bfloat16)
    b2_3 = (jax.random.normal(k_b2, (E3,), dtype=jnp.float32) * 0.02).astype(jnp.bfloat16)

    out3 = mlp_forward(x3, w1_3, b1_3, w2_3, b2_3, tm=128, th=256)
    jax.block_until_ready(out3)
    ref3 = _reference(x3, w1_3, b1_3, w2_3, b2_3)
    assert jnp.allclose(out3.astype(jnp.float32), ref3, atol=2e-2, rtol=5e-2), \
        "mismatch (check 3)"

    print("KERNEL_OK")
</pallas_src>

<mosaic_0001>
module attributes {stable_mosaic.version = 11 : i64} {
  func.func @_mlp_kernel_full(%arg0: i32, %arg1: memref<16x32xf32, #tpu.memory_space<vmem>>, %arg2: memref<32x128xf32, #tpu.memory_space<vmem>>, %arg3: memref<1x128xf32, #tpu.memory_space<vmem>>, %arg4: memref<128x32xf32, #tpu.memory_space<vmem>>, %arg5: memref<1x32xf32, #tpu.memory_space<vmem>>, %arg6: memref<16x32xf32, #tpu.memory_space<vmem>>) attributes {dimension_semantics = [#tpu.dimension_semantics<parallel>], iteration_bounds = array<i64: 1>, scalar_prefetch = 0 : i64, scratch_operands = 0 : i64, tpu.core_type = #tpu.core_type<tc>, window_params = [{transform_indices = @transform_0, window_bounds = array<i64: 16, 32>}, {pipeline_mode = #tpu.pipeline_mode<synchronous>, transform_indices = @transform_1, window_bounds = array<i64: 32, 128>}, {pipeline_mode = #tpu.pipeline_mode<synchronous>, transform_indices = @transform_2, window_bounds = array<i64: 1, 128>}, {pipeline_mode = #tpu.pipeline_mode<synchronous>, transform_indices = @transform_3, window_bounds = array<i64: 128, 32>}, {pipeline_mode = #tpu.pipeline_mode<synchronous>, transform_indices = @transform_4, window_bounds = array<i64: 1, 32>}, {transform_indices = @transform_5, window_bounds = array<i64: 16, 32>}]} {
    %c0 = arith.constant 0 : index
    %c0_0 = arith.constant 0 : index
    %0 = vector.load %arg1[%c0, %c0_0] : memref<16x32xf32, #tpu.memory_space<vmem>>, vector<16x32xf32>
    %c0_1 = arith.constant 0 : index
    %c0_2 = arith.constant 0 : index
    %1 = vector.load %arg2[%c0_1, %c0_2] : memref<32x128xf32, #tpu.memory_space<vmem>>, vector<32x128xf32>
    %c0_3 = arith.constant 0 : index
    %c0_4 = arith.constant 0 : index
    %2 = vector.load %arg4[%c0_3, %c0_4] : memref<128x32xf32, #tpu.memory_space<vmem>>, vector<128x32xf32>
    %cst = arith.constant dense<0.000000e+00> : vector<16x128xf32>
    %3 = tpu.matmul %0, %1, %cst {dimension_numbers = #tpu.dot_dimension_numbers<[1], [0], [0], [1], [0, 0, 1, 1], [], []>} : vector<16x32xf32>, vector<32x128xf32>, vector<16x128xf32> -> vector<16x128xf32>
    %c0_5 = arith.constant 0 : index
    %c0_6 = arith.constant 0 : index
    %4 = vector.load %arg3[%c0_5, %c0_6] : memref<1x128xf32, #tpu.memory_space<vmem>>, vector<1x128xf32>
    %5 = vector.broadcast %4 : vector<1x128xf32> to vector<16x128xf32>
    %6 = arith.addf %3, %5 : vector<16x128xf32>
    %cst_7 = arith.constant 5.000000e-01 : f32
    %7 = vector.broadcast %cst_7 : f32 to vector<16x128xf32>
    %8 = arith.mulf %7, %6 : vector<16x128xf32>
    %cst_8 = arith.constant 0.707106769 : f32
    %9 = vector.broadcast %cst_8 : f32 to vector<16x128xf32>
    %10 = arith.mulf %6, %9 : vector<16x128xf32>
    %11 = math.erf %10 : vector<16x128xf32>
    %cst_9 = arith.constant 1.000000e+00 : f32
    %12 = vector.broadcast %cst_9 : f32 to vector<16x128xf32>
    %13 = arith.addf %12, %11 : vector<16x128xf32>
    %14 = arith.mulf %8, %13 : vector<16x128xf32>
    %cst_10 = arith.constant dense<0.000000e+00> : vector<16x32xf32>
    %15 = tpu.matmul %14, %2, %cst_10 {dimension_numbers = #tpu.dot_dimension_numbers<[1], [0], [0], [1], [0, 0, 1, 1], [], []>} : vector<16x128xf32>, vector<128x32xf32>, vector<16x32xf32> -> vector<16x32xf32>
    %c0_11 = arith.constant 0 : index
    %c0_12 = arith.constant 0 : index
    %16 = vector.load %arg5[%c0_11, %c0_12] : memref<1x32xf32, #tpu.memory_space<vmem>>, vector<1x32xf32>
    %17 = vector.broadcast %16 : vector<1x32xf32> to vector<16x32xf32>
    %18 = arith.addf %15, %17 : vector<16x32xf32>
    %c0_13 = arith.constant 0 : index
    %c0_14 = arith.constant 0 : index
    %19 = vector.load %arg6[%c0_13, %c0_14] : memref<16x32xf32, #tpu.memory_space<vmem>>, vector<16x32xf32>
    tpu.vector_store %arg6[%c0_13, %c0_14], %18 {strides = array<i32>} : memref<16x32xf32, #tpu.memory_space<vmem>>, vector<16x32xf32>,
    return
  }
  func.func @transform_0(%arg0: i32) -> (i32, i32) {
    %c0_i32 = arith.constant 0 : i32
    %c0_i32_0 = arith.constant 0 : i32
    return %arg0, %c0_i32 : i32, i32
  }
  func.func @transform_1(%arg0: i32) -> (i32, i32) {
    %c0_i32 = arith.constant 0 : i32
    %c0_i32_0 = arith.constant 0 : i32
    %c0_i32_1 = arith.constant 0 : i32
    return %c0_i32, %c0_i32_0 : i32, i32
  }
  func.func @transform_2(%arg0: i32) -> (i32, i32) {
    %c0_i32 = arith.constant 0 : i32
    %c0_i32_0 = arith.constant 0 : i32
    %c0_i32_1 = arith.constant 0 : i32
    return %c0_i32, %c0_i32_0 : i32, i32
  }
  func.func @transform_3(%arg0: i32) -> (i32, i32) {
    %c0_i32 = arith.constant 0 : i32
    %c0_i32_0 = arith.constant 0 : i32
    %c0_i32_1 = arith.constant 0 : i32
    return %c0_i32, %c0_i32_0 : i32, i32
  }
  func.func @transform_4(%arg0: i32) -> (i32, i32) {
    %c0_i32 = arith.constant 0 : i32
    %c0_i32_0 = arith.constant 0 : i32
    %c0_i32_1 = arith.constant 0 : i32
    return %c0_i32, %c0_i32_0 : i32, i32
  }
  func.func @transform_5(%arg0: i32) -> (i32, i32) {
    %c0_i32 = arith.constant 0 : i32
    %c0_i32_0 = arith.constant 0 : i32
    return %arg0, %c0_i32 : i32, i32
  }
}

</mosaic_0001>

<bundles_post_ra>
// kernel: tpu_custom_call.1
= control target key start
LH: loop header
LB: loop body
LE: loop exit
PB: predicated region body
PF: predicated region fallthrough
CT: control target
= control target key end

     0   :  { %vm50_vm0 = vcmask 261120   ;;  %s508_s0 = inlined_call_operand.vmem [shape: f32[16,32], index: 0, kind: input, shape index: {}]   ;;  %s509_s1 = inlined_call_operand.vmem [shape: f32[32,128], index: 1, kind: input, shape index: {}]   ;;  %s510_s2 = inlined_call_operand.vmem [shape: f32[1,128], index: 2, kind: input, shape index: {}]   ;;  %s511_s3 = inlined_call_operand.vmem [shape: f32[128,32], index: 3, kind: input, shape index: {}]   ;;  %s512_s4 = inlined_call_operand.vmem [shape: f32[1,32], index: 4, kind: input, shape index: {}]   ;;  %s513_s5 = inlined_call_operand.hbm [shape: f32[16,32], index: 5, kind: output, shape index: {}]  }
   0x1   :  { %v23_v0 = vld [vmem:[%s509_s1] sm:$0xff]  ;;  %v24_v1 = vld [vmem:[%s509_s1 + $0x8] sm:$0xff]  ;;  %v25_v2 = vld [vmem:[%s509_s1 + $0x10] sm:$0xff] }
   0x2   :  { %v316_v3 = vpack.c.bf16 %v24_v1, %v23_v0  ;;  %v26_v4 = vld [vmem:[%s509_s1 + $0x18] sm:$0xff]  ;;  %v21_v5 = vld [vmem:[%s508_s0] sm:$0xff]  ;;  %v28_v8 = vld [vmem:[%s511_s3 + $0x8] sm:$0xff] }
   0x3   :  { %v320_v6 = vpack.c.bf16 %v26_v4, %v25_v2  ;;  %278 = vmatprep.mubr.msk.f32.mxu0 %vm50_vm0, %v21_v5  ;;  %v27_v7 = vld [vmem:[%s511_s3] sm:$0xff]  ;;  %v29_v9 = vld [vmem:[%s511_s3 + $0x10] sm:$0xff]  ;;  %v30_v11 = vld [vmem:[%s511_s3 + $0x18] sm:$0xff] }
   0x4   :  { %317 = vmatprep.subr.bf16.mxu0 %v316_v3  ;;  %v324_v10 = vpack.c.bf16 %v28_v8, %v27_v7  ;;  %v328_v12 = vpack.c.bf16 %v30_v11, %v29_v9  ;;  %v31_v13 = vld [vmem:[%s511_s3 + $0x20] sm:$0xff]  ;;  %v32_v14 = vld [vmem:[%s511_s3 + $0x28] sm:$0xff] }
   0x5   :  { %319 = vmatpush3.bf16.msra.mxu0 %v316_v3 }
   0x6   :  { %10 = vsyncpa [#allocation3], 0  ;;  %321 = vmatprep.subr.bf16.mxu0 %v320_v6  ;;  %325 = vmatprep.subr.bf16.mxu1 %v324_v10  ;;  %v332_v15 = vpack.c.bf16 %v32_v14, %v31_v13  ;;  %v22_v16 = vld [vmem:[%s508_s0 + $0x8] sm:$0xff]  ;;  %v33_v17 = vld [vmem:[%s511_s3 + $0x30] sm:$0xff]  ;;  %s387_s11 = smov [#allocation2]  }
   0x7   :  { %327 = vmatpush3.bf16.msra.mxu1 %v324_v10  ;;  %v34_v18 = vld [vmem:[%s511_s3 + $0x38] sm:$0xff]  ;;  %v35_v20 = vld [vmem:[%s511_s3 + $0x40] sm:$0xff]  ;;  %v36_v21 = vld [vmem:[%s511_s3 + $0x48] sm:$0xff]  ;;  %s231_s12 = sshll.u32 %s387_s11, 4  ;;  %s232_s12 = int_to_ptr.vmem [resolvable:$true] %s231_s12 }
   0x8   :  { %329 = vmatprep.subr.bf16.mxu1 %v328_v12  ;;  %v336_v19 = vpack.c.bf16 %v34_v18, %v33_v17  ;;  %v340_v22 = vpack.c.bf16 %v36_v21, %v35_v20  ;;  %v37_v23 = vld [vmem:[%s511_s3 + $0x50] sm:$0xff]  ;;  %v38_v24 = vld [vmem:[%s511_s3 + $0x58] sm:$0xff]  ;;  %v39_v26 = vld [vmem:[%s511_s3 + $0x60] sm:$0xff]  ;;  %s363_s13 = scalar_lea.vmem %s232_s12, 256  ;;  %p368_p1 = scmp.lt.s32.totalorder %s232_s12, %s232_s12 }
   0x9   :  { %323 = vmatpush3.bf16.msra.mxu0 %v320_v6  ;;  %v344_v25 = vpack.c.bf16 %v38_v24, %v37_v23  ;;  %v40_v27 = vld [vmem:[%s511_s3 + $0x68] sm:$0xff]  ;;  %v41_v29 = vld [vmem:[%s511_s3 + $0x70] sm:$0xff]  ;;  %v42_v30 = vld [vmem:[%s511_s3 + $0x78] sm:$0xff]  ;;  %p364_p0 = scmp.ne.s32.totalorder %s232_s12, %s363_s13  ;;  %p369_p2 = scmp.lt.s32.totalorder %s363_s13, %s363_s13 }
   0xa   :  { %v348_v28 = vpack.c.bf16 %v40_v27, %v39_v26  ;;  %v352_v31 = vpack.c.bf16 %v42_v30, %v41_v29  ;;  %v242_v32 = vld [vmem:[%s510_s2] ss:$0 sm:$0xff] }
   0xb   :  { %331 = vmatpush3.bf16.msra.mxu1 %v328_v12  ;;  %v245_v47 = vld [vmem:[%s512_s4] ss:$0 sm:$0xff]  ;;  %p370_p3 = por %p369_p2, %p368_p1 }
   0xc   :  { %279 = vmatmul.mubr.msk.f32.vlgmr.msra.gmra.mrb[0].mxu0 %vm50_vm0, %v22_v16  ;;  %333 = vmatprep.subr.bf16.mxu1 %v332_v15 }
   0xd   :  { %p371_p4 = pnand %p370_p3, %p364_p0 }
   0xf   :  { %335 = vmatpush3.bf16.msra.mxu1 %v332_v15 }
  0x10   :  { %337 = vmatprep.subr.bf16.mxu1 %v336_v19 }
  0x13   :  { %339 = vmatpush3.bf16.msra.mxu1 %v336_v19 }
  0x14   :  { %341 = vmatprep.subr.bf16.mxu1 %v340_v22 }
  0x17   :  { %343 = vmatpush3.bf16.msra.mxu1 %v340_v22 }
  0x18   :  { %345 = vmatprep.subr.bf16.mxu1 %v344_v25 }
  0x1b   :  { %347 = vmatpush3.bf16.msra.mxu1 %v344_v25 }
  0x1c   :  { %349 = vmatprep.subr.bf16.mxu1 %v348_v28 }
  0x1f   :  { %351 = vmatpush3.bf16.msra.mxu1 %v348_v28 }
  0x20   :  { %353 = vmatprep.subr.bf16.mxu1 %v352_v31 }
  0x23   :  { %355 = vmatpush3.bf16.msra.mxu1 %v352_v31 }
  0xdf   :  { %v280_v33 = vpop.f32.mrb[0].mxu0 }
  0xe0   :  { %v129_v34 = vadd.f32 %v280_v33, %v242_v32  ;;  %v123_v35 = vpop.f32.mrb[1].mxu0 }
  0xe1   :  { %v124_v36 = vadd.f32 %v242_v32, %v123_v35 }
  0xe2   :  { %v135_v37 = vmul.f32 0.70710677, %v129_v34  ;;  %v133_v44 = vmul.f32 0.5, %v129_v34 }
  0xe3   :  { %v134_v38 = vmul.f32 0.70710677, %v124_v36  ;;  %v132_v42 = vmul.f32 0.5, %v124_v36 }
  0xe4   :  { %359 = verf.f32 %v135_v37 }
  0xe5   :  { %361 = verf.f32 %v134_v38 }
  0xee   :  { %v360_v39 = vpop.eup %359 }
  0xef   :  { %v362_v40 = vpop.eup %361  ;;  %v139_v41 = vadd.f32 1.0, %v360_v39 }
  0xf0   :  { %v138_v43 = vadd.f32 1.0, %v362_v40 }
  0xf1   :  { %v141_v46 = vmul.f32 %v139_v41, %v133_v44 }
  0xf2   :  { %v140_v45 = vmul.f32 %v138_v43, %v132_v42 }
  0xf4   :  { %313 = vmatprep.mubr.f32.mxu1 %v140_v45 }
  0xf5   :  { %314 = vmatmul.mubr.f32.vlgmr.msra.gmra.mrb[0].mxu1 %v141_v46 }
 0x1c8   :  { %v315_v48 = vpop.f32.mrb[0].mxu1 }
 0x1c9   :  { %v221_v49 = vadd.f32 %v315_v48, %v245_v47  ;;  %v215_v50 = vpop.f32.mrb[1].mxu1 }
 0x1ca   :  { %v216_v51 = vadd.f32 %v245_v47, %v215_v50 }
 0x1cb   :  { %225 = vst.msk [vmem:[#allocation2 + $0x8] sm:$0xff] %vm50_vm0, %v221_v49 }
 0x1cc   :  { %224 = vst.msk [vmem:[#allocation2] sm:$0xff] %vm50_vm0, %v216_v51 }
 0x1cd   :  { %374 = shalt.err (!%p371_p4)
}
 0x1ce   :  { %s375_s15 = scalar_lea.hbm %s513_s5, 256 }
 0x1cf   :  { %p376_p5 = scmp.ne.s32.totalorder %s513_s5, %s375_s15  ;;  %p379_p6 = scmp.lt.u32.totalorder %s375_s15, %s513_s5 }
 0x1d1   :  { %p381_p7 = pnand %p379_p6, %p376_p5 }
 0x1d3   :  { %384 = shalt.err (!%p381_p7)
}
 0x1d4   :  { %s388_s20 = smov 128   ;;  %s389_s21 = smov 8  }
 0x1d5   :  { %237 = dma.vmem_to_hbm [thread:$0]  %s232_s12, 256, %s513_s5, [#allocation3], %s388_s20, %s388_s20, %s389_s21  }
 0x1d6   :  { %385 = dma.done.wait [#allocation3], 256  }
 0x1d7   :  { %386 = vsyncadd [#allocation3], 4294967040 }
 0x1d8   :  { %241 = vsyncpa [#allocation3], 1 }

</bundles_post_ra>
